<compile_context>
chip_gen: v6e
topology: v6e:2x2x1
jax: 0.10.0
libtpu: 0.0.40
codegen_flags: <defaults>
</compile_context>

<pallas_src>
import functools

import jax
import jax.numpy as jnp
from jax.experimental import pallas as pl
from jax.experimental.pallas import tpu as pltpu


def _rmsnorm_kernel(x_ref, w_ref, o_ref, *, eps, hidden):
    # x_ref: (row_tile, hidden) VMEM tile; w_ref: (1, hidden); o_ref like x_ref.
    x = x_ref[...].astype(jnp.float32)
    # mean of squares over last axis: VPU multiply + XLU cross-lane reduce,
    # with 1/hidden folded into the rsqrt argument.
    ms = jnp.sum(x * x, axis=-1, keepdims=True) * (1.0 / hidden)   # (row_tile, 1)
    inv = jax.lax.rsqrt(ms + eps)                                  # EUP slot
    w = w_ref[...].astype(jnp.float32)                             # (1, hidden)
    # (x * inv) * w : scale by the per-row scalar first, then by the weight row.
    o_ref[...] = ((x * inv) * w).astype(o_ref.dtype)


def _sublane_pack(dtype):
    # rows-per-sublane packing: 8 for f32, 16 for bf16, 32 for int8.
    return max(8, 32 // jnp.dtype(dtype).itemsize)


def _pick_row_tile(rows, hidden, dtype, *, vmem_budget_bytes, max_rows=1024):
    """Largest row tile (multiple of the sublane pack) fitting the VMEM budget."""
    pack = _sublane_pack(dtype)
    isize = jnp.dtype(dtype).itemsize
    # double-buffered input + output tiles, plus ~3 full-tile f32 intermediates.
    per_row_bytes = hidden * (2 * isize + 2 * isize + 3 * 4)
    tile = vmem_budget_bytes // max(per_row_bytes, 1)
    tile = min(tile, max_rows)
    tile = max((tile // pack) * pack, pack)
    if tile >= rows:
        return rows  # full-extent block along rows is always legal
    return tile


def rmsnorm(x, weight, eps=1e-5, *, row_tile=None,
            vmem_budget_bytes=32 * 1024 * 1024):
    """RMSNorm over the last axis of x. weight has shape (hidden,)."""
    orig_shape = x.shape
    hidden = orig_shape[-1]
    assert weight.shape == (hidden,)

    rows = 1
    for d in orig_shape[:-1]:
        rows *= d
    x2d = x.reshape(rows, hidden)
    w2d = weight.reshape(1, hidden)

    pack = _sublane_pack(x.dtype)
    if row_tile is None:
        row_tile = _pick_row_tile(rows, hidden, x.dtype,
                                  vmem_budget_bytes=vmem_budget_bytes)
    else:
        # Sanitize externally supplied tiles: must be <= rows and, if it does
        # not span all rows, a multiple of the sublane packing.
        row_tile = min(int(row_tile), rows)
        if row_tile < rows:
            row_tile = max((row_tile // pack) * pack, pack)
            if row_tile >= rows:
                row_tile = rows

    # Ragged rows are handled by cdiv + masked partial last block (rows are
    # independent, so padded tail rows never contaminate valid outputs).
    grid = (pl.cdiv(rows, row_tile),)

    kernel = functools.partial(_rmsnorm_kernel, eps=float(eps), hidden=hidden)

    out2d = pl.pallas_call(
        kernel,
        out_shape=jax.ShapeDtypeStruct((rows, hidden), x.dtype),
        grid_spec=pltpu.PrefetchScalarGridSpec(
            num_scalar_prefetch=0,
            grid=grid,
            in_specs=[
                pl.BlockSpec((row_tile, hidden), lambda i: (i, 0)),
                # constant (0, 0) block: Pallas skips the re-DMA across steps.
                pl.BlockSpec((1, hidden), lambda i: (0, 0)),
            ],
            out_specs=pl.BlockSpec((row_tile, hidden), lambda i: (i, 0)),
        ),
        compiler_params=pltpu.CompilerParams(
            dimension_semantics=("parallel",),
            # Explicit scoped-VMEM limit: above the 32 MiB tile budget used for
            # tiling, safely below v7x's 64 MiB physical VMEM.
            vmem_limit_bytes=48 * 1024 * 1024,
        ),
    )(x2d, w2d)

    return out2d.reshape(orig_shape)


def rmsnorm_ref(x, weight, eps=1e-5):
    # Pure-JAX reference mirroring the PyTorch forward exactly.
    norm = jnp.sqrt(jnp.mean(x.astype(jnp.float32) ** 2, axis=-1, keepdims=True) + eps)
    return (x.astype(jnp.float32) * (weight.astype(jnp.float32) / norm)).astype(x.dtype)


if __name__ == "__main__":
    k1, k2, k3 = jax.random.split(jax.random.PRNGKey(0), 3)

    # --- test 1: small shape matching the module (batch, seq, hidden) -------
    batch, seq, hidden = 2, 8, 32
    x = jax.random.normal(k1, (batch, seq, hidden), dtype=jnp.float32)
    weight = jnp.ones((hidden,), dtype=jnp.float32)  # module initializes weight to ones

    out = jax.block_until_ready(rmsnorm(x, weight, eps=1e-5))
    ref = rmsnorm_ref(x, weight, eps=1e-5)
    assert out.shape == x.shape and out.dtype == x.dtype
    assert jnp.allclose(out, ref, atol=1e-5, rtol=1e-5)

    # --- test 2: multi-step pipelined grid with a ragged (masked) tail ------
    x2 = jax.random.normal(k2, (3, 40, 256), dtype=jnp.float32)    # rows = 120
    w2 = 1.0 + 0.1 * jax.random.normal(k3, (256,), dtype=jnp.float32)
    out2 = jax.block_until_ready(rmsnorm(x2, w2, eps=1e-5, row_tile=32))  # grid = cdiv(120, 32) = 4
    ref2 = rmsnorm_ref(x2, w2, eps=1e-5)
    assert out2.shape == x2.shape and out2.dtype == x2.dtype
    assert jnp.allclose(out2, ref2, atol=1e-5, rtol=1e-5)

    print("KERNEL_OK")
</pallas_src>

<mosaic_0001>
module attributes {stable_mosaic.version = 11 : i64} {
  func.func @_rmsnorm_kernel(%arg0: i32, %arg1: memref<16x32xf32, #tpu.memory_space<vmem>>, %arg2: memref<1x32xf32, #tpu.memory_space<vmem>>, %arg3: memref<16x32xf32, #tpu.memory_space<vmem>>) attributes {dimension_semantics = [#tpu.dimension_semantics<parallel>], iteration_bounds = array<i64: 1>, scalar_prefetch = 0 : i64, scratch_operands = 0 : i64, tpu.core_type = #tpu.core_type<tc>, window_params = [{transform_indices = @transform_0, window_bounds = array<i64: 16, 32>}, {pipeline_mode = #tpu.pipeline_mode<synchronous>, transform_indices = @transform_1, window_bounds = array<i64: 1, 32>}, {transform_indices = @transform_2, window_bounds = array<i64: 16, 32>}]} {
    %c0 = arith.constant 0 : index
    %c0_0 = arith.constant 0 : index
    %0 = vector.load %arg1[%c0, %c0_0] : memref<16x32xf32, #tpu.memory_space<vmem>>, vector<16x32xf32>
    %1 = arith.mulf %0, %0 : vector<16x32xf32>
    %cst = arith.constant dense<0.000000e+00> : vector<16xf32>
    %2 = vector.multi_reduction <add>, %1, %cst [1] : vector<16x32xf32> to vector<16xf32>
    %3 = vector.shape_cast %2 : vector<16xf32> to vector<16x1xf32>
    %cst_1 = arith.constant 3.125000e-02 : f32
    %4 = vector.broadcast %cst_1 : f32 to vector<16x1xf32>
    %5 = arith.mulf %3, %4 : vector<16x1xf32>
    %cst_2 = arith.constant 9.99999974E-6 : f32
    %6 = vector.broadcast %cst_2 : f32 to vector<16x1xf32>
    %7 = arith.addf %5, %6 : vector<16x1xf32>
    %8 = math.rsqrt %7 : vector<16x1xf32>
    %c0_3 = arith.constant 0 : index
    %c0_4 = arith.constant 0 : index
    %9 = vector.load %arg2[%c0_3, %c0_4] : memref<1x32xf32, #tpu.memory_space<vmem>>, vector<1x32xf32>
    %10 = vector.broadcast %8 : vector<16x1xf32> to vector<16x32xf32>
    %11 = arith.mulf %0, %10 : vector<16x32xf32>
    %12 = vector.broadcast %9 : vector<1x32xf32> to vector<16x32xf32>
    %13 = arith.mulf %11, %12 : vector<16x32xf32>
    %c0_5 = arith.constant 0 : index
    %c0_6 = arith.constant 0 : index
    %14 = vector.load %arg3[%c0_5, %c0_6] : memref<16x32xf32, #tpu.memory_space<vmem>>, vector<16x32xf32>
    tpu.vector_store %arg3[%c0_5, %c0_6], %13 {strides = array<i32>} : memref<16x32xf32, #tpu.memory_space<vmem>>, vector<16x32xf32>,
    return
  }
  func.func @transform_0(%arg0: i32) -> (i32, i32) {
    %c0_i32 = arith.constant 0 : i32
    %c0_i32_0 = arith.constant 0 : i32
    return %arg0, %c0_i32 : i32, i32
  }
  func.func @transform_1(%arg0: i32) -> (i32, i32) {
    %c0_i32 = arith.constant 0 : i32
    %c0_i32_0 = arith.constant 0 : i32
    %c0_i32_1 = arith.constant 0 : i32
    return %c0_i32, %c0_i32_0 : i32, i32
  }
  func.func @transform_2(%arg0: i32) -> (i32, i32) {
    %c0_i32 = arith.constant 0 : i32
    %c0_i32_0 = arith.constant 0 : i32
    return %arg0, %c0_i32 : i32, i32
  }
}

</mosaic_0001>

<bundles_post_ra>
// kernel: tpu_custom_call.1
= control target key start
LH: loop header
LB: loop body
LE: loop exit
PB: predicated region body
PF: predicated region fallthrough
CT: control target
= control target key end

     0   :  { %7 = vsyncpa [#allocation3], 0  ;;  %s164_s0 = inlined_call_operand.hbm [shape: f32[16,32], index: 0, kind: input, shape index: {}]   ;;  %s165_s1 = inlined_call_operand.vmem [shape: f32[1,32], index: 1, kind: input, shape index: {}]   ;;  %s166_s2 = inlined_call_operand.hbm [shape: f32[16,32], index: 2, kind: output, shape index: {}]  }
   0x1   :  { %8 = vsyncpa [#allocation4], 0  ;;  %s126_s9 = smov [#allocation2]  }
   0x2   :  { %s14_s10 = sshll.u32 %s126_s9, 4  ;;  %s15_s10 = int_to_ptr.vmem [resolvable:$true] %s14_s10 }
   0x3   :  { %s90_s11 = scalar_lea.vmem %s15_s10, 256  ;;  %p95_p1 = scmp.lt.s32.totalorder %s15_s10, %s15_s10 }
   0x4   :  { %p91_p0 = scmp.ne.s32.totalorder %s15_s10, %s90_s11  ;;  %p96_p2 = scmp.lt.s32.totalorder %s90_s11, %s90_s11 }
   0x6   :  { %p97_p3 = por %p96_p2, %p95_p1 }
   0x8   :  { %p98_p4 = pnand %p97_p3, %p91_p0 }
   0xa   :  { %101 = shalt.err (!%p98_p4)
}
   0xb   :  { %s127_s12 = smov 128   ;;  %s128_s13 = smov 8  }
   0xc   :  { %20 = dma.hbm_to_vmem [thread:$0]  %s164_s0, 256, %s15_s10, [#allocation3], %s127_s12, %s127_s12, %s128_s13  }
   0xd   :  { %122 = dma.done.wait [#allocation3], 256  }
   0xe   :  { %123 = vsyncadd [#allocation3], 4294967040  ;;  %v26_v0 = vld [vmem:[#allocation2] sm:$0xff]  ;;  %vm30_vm0 = vcmask 261120   ;;  %v27_v1 = vld [vmem:[#allocation2 + $0x8] sm:$0xff]  ;;  %s129_s17 = smov [#allocation5]  }
   0xf   :  { %v28_v2 = vmul.f32 %v26_v0, %v26_v0  ;;  %v29_v3 = vmul.f32 %v27_v1, %v27_v1  ;;  %v73_v13 = vld [vmem:[%s165_s1] ss:$0 sm:$0xff]  ;;  %s61_s18 = sshll.u32 %s129_s17, 4  ;;  %s62_s18 = int_to_ptr.vmem [resolvable:$true] %s61_s18 }
  0x10   :  { %s102_s19 = scalar_lea.vmem %s62_s18, 256  ;;  %p107_p6 = scmp.lt.s32.totalorder %s62_s18, %s62_s18 }
  0x11   :  { %v31_v4 = vsel %vm30_vm0, %v28_v2, 0.0  ;;  %v34_v5 = vsel %vm30_vm0, %v29_v3, 0.0  ;;  %p103_p5 = scmp.ne.s32.totalorder %s62_s18, %s102_s19  ;;  %p108_p7 = scmp.lt.s32.totalorder %s102_s19, %s102_s19 }
  0x12   :  { %32 = vadd.xlane.f32.xlu0 %v31_v4 }
  0x13   :  { %p109_p8 = por %p108_p7, %p107_p6 }
  0x15   :  { %p110_p9 = pnand %p109_p8, %p103_p5 }
  0x16   :  { %35 = vadd.xlane.f32.xlu0 %v34_v5 }
  0x9b   :  { %v33_v6 = vpop.xlane.xlu0 %32 }
  0x9c   :  { %v37_v7 = vmul.f32 0.03125, %v33_v6 }
  0x9e   :  { %v39_v8 = vadd.f32 1e-05, %v37_v7 }
  0x9f   :  { %v36_v9 = vpop.xlane.xlu0 %35 }
  0xa0   :  { %78 = vrsqrt.f32 %v39_v8  ;;  %v38_v10 = vmul.f32 0.03125, %v36_v9 }
  0xa2   :  { %v40_v11 = vadd.f32 1e-05, %v38_v10 }
  0xa4   :  { %80 = vrsqrt.f32 %v40_v11 }
  0xad   :  { %v79_v12 = vpop.eup %78 }
  0xae   :  { %v44_v14 = vmul.f32 %v79_v12, %v26_v0 }
  0xb0   :  { %v52_v15 = vmul.f32 %v73_v13, %v44_v14 }
  0xb1   :  { %v81_v16 = vpop.eup %80 }
  0xb2   :  { %v45_v17 = vmul.f32 %v81_v16, %v27_v1  ;;  %54 = vst.msk [vmem:[#allocation5] sm:$0xff] %vm30_vm0, %v52_v15 }
  0xb4   :  { %v53_v18 = vmul.f32 %v73_v13, %v45_v17 }
  0xb6   :  { %55 = vst.msk [vmem:[#allocation5 + $0x8] sm:$0xff] %vm30_vm0, %v53_v18 }
  0xb7   :  { %113 = shalt.err (!%p110_p9)
}
  0xb8   :  { %67 = dma.vmem_to_hbm [thread:$0]  %s62_s18, 256, %s166_s2, [#allocation4], %s127_s12, %s127_s12, %s128_s13  }
  0xb9   :  { %124 = dma.done.wait [#allocation4], 256  }
  0xba   :  { %125 = vsyncadd [#allocation4], 4294967040 }
  0xbb   :  { %71 = vsyncpa [#allocation3], 1 }
  0xbc   :  { %72 = vsyncpa [#allocation4], 1 }

</bundles_post_ra>
